<compile_context>
chip_gen: v7x
topology: tpu7x:2x2x1
jax: 0.10.0
libtpu: 0.0.40
codegen_flags: <defaults>
</compile_context>

<pallas_src>
import jax
import jax.numpy as jnp
from jax.experimental import pallas as pl
from jax.experimental.pallas import tpu as pltpu

_NEG_PAD = -1.0e30  # bias for padded logit columns: exp(-1e30 - m) == 0 exactly
_LANE = 128         # lane-dense padded matmul width


def _round_up(v, m):
    return ((v + m - 1) // m) * m


def hierachy_classify_kernel(x_ref, w_ref, b_ref, out_ref):
    # Folded linear: (TB, F) @ (F, NP) + (1, NP) -> logits (pad cols ~ -1e30).
    logits = (
        jnp.dot(x_ref[...], w_ref[...], preferred_element_type=jnp.float32)
        + b_ref[...]
    )
    # Numerically stable log_softmax over the last axis.
    m = jnp.max(logits, axis=-1, keepdims=True)
    s = logits - m
    lse = jnp.log(jnp.sum(jnp.exp(s), axis=-1, keepdims=True))
    res = s - lse
    # Store only as many columns as the output block carries (n_out by default,
    # NP in the lane-dense variant).  Static slice; pad columns never hit HBM.
    out_ref[...] = res[:, : out_ref.shape[-1]].astype(out_ref.dtype)


def prepare_params(w1, b1, w2, b2, lane_pad=_LANE):
    """One-time parameter prep (hoisted out of the per-call hot path).

    Folds Linear_2(Linear_1(.)) into a single affine map and pads the matmul
    output axis to `lane_pad` lanes.  Done in f32 for exact composition.
    """
    n_out = w2.shape[0]
    n_pad = _round_up(n_out, lane_pad)

    w_folded = jnp.dot(w1.T.astype(jnp.float32), w2.T.astype(jnp.float32))      # (F, n_out)
    b_folded = (jnp.dot(b1.astype(jnp.float32), w2.T.astype(jnp.float32))
                + b2.astype(jnp.float32))                                        # (n_out,)

    w_pad = jnp.pad(w_folded, ((0, 0), (0, n_pad - n_out)))                      # zero cols
    b_pad = jnp.pad(b_folded, ((0, n_pad - n_out),), constant_values=_NEG_PAD)
    return w_pad, b_pad.reshape(1, n_pad), n_out


def hierachy_classify(x, w_pad, b_pad, n_out, *, max_tb=4096, lane_dense_out=False):
    """x: (B, F) f32; w_pad: (F, NP); b_pad: (1, NP) from prepare_params.

    Returns (B, n_out) log-probs by default.  With lane_dense_out=True returns
    the padded (B, NP) buffer (columns >= n_out hold ~-1e30 junk); the consumer
    is expected to fuse the `[:, :n_out]` slice downstream.
    """
    B, F = x.shape
    NP = w_pad.shape[1]
    out_cols = NP if lane_dense_out else int(n_out)

    # ---- Batch tile selection --------------------------------------------
    if B < 16:
        tb = B                                   # tiny batch: single block
    else:
        # >=2 blocks so both v7x TensorCores get work; sublane-aligned tile.
        tb = min(max_tb, _round_up(pl.cdiv(B, 2), 8))
        # v7x-safe cap: 2x(x tile) + 2x(out tile) + resident W/b under ~40 MiB.
        resident = (F * NP + NP) * 4
        per_row = (2 * F + 2 * out_cols) * 4
        tb_cap = max(8, ((40 * 1024 * 1024 - resident) // per_row) // 8 * 8)
        tb = min(tb, tb_cap)
    grid = (pl.cdiv(B, tb),)                     # partial last block is handled

    # ---- Explicit VMEM limit when the tile exceeds the 32 MiB default ----
    est_vmem = (F * NP + NP) * 4 + (2 * F + 2 * out_cols) * 4 * tb + (1 << 20)
    vmem_limit = None
    if est_vmem > 32 * 1024 * 1024:
        vmem_limit = min(_round_up(est_vmem, 1 << 20), 48 * 1024 * 1024)

    cost = pl.CostEstimate(
        flops=2 * B * F * NP,
        transcendentals=B * NP,
        bytes_accessed=(B * F + F * NP + NP + B * out_cols) * 4,
    )

    out = pl.pallas_call(
        hierachy_classify_kernel,
        out_shape=jax.ShapeDtypeStruct((B, out_cols), jnp.float32),
        grid_spec=pltpu.PrefetchScalarGridSpec(
            num_scalar_prefetch=0,
            grid=grid,
            in_specs=[
                pl.BlockSpec((tb, F), lambda i: (i, 0)),    # x rows (pipelined)
                pl.BlockSpec((F, NP), lambda i: (0, 0)),    # folded W (resident)
                pl.BlockSpec((1, NP), lambda i: (0, 0)),    # folded bias (resident)
            ],
            out_specs=pl.BlockSpec((tb, out_cols), lambda i: (i, 0)),
        ),
        compiler_params=pltpu.CompilerParams(
            dimension_semantics=("parallel",),
            vmem_limit_bytes=vmem_limit,
        ),
        cost_estimate=cost,
    )(x, w_pad, b_pad)

    return out


def reference(x, w1, b1, w2, b2):
    tx = x @ w1.T + b1
    ty = tx @ w2.T + b2
    return jax.nn.log_softmax(jnp.squeeze(ty), axis=-1)


if __name__ == "__main__":
    # Module hyperparameters (small, consistent with the PyTorch __init__).
    n_hid, hierachy_layer, n_out = 16, 2, 10
    n_hid_total = n_hid * hierachy_layer            # 32
    mid = (n_hid_total + n_out) // 2                # 21
    B = 8

    key = jax.random.PRNGKey(0)
    kx, kw1, kb1, kw2, kb2, kx2 = jax.random.split(key, 6)

    x = jax.random.normal(kx, (B, n_hid_total), dtype=jnp.float32)
    # Deterministic, Linear-like init (uniform in +/- 1/sqrt(fan_in)).
    lim1 = 1.0 / (n_hid_total ** 0.5)
    lim2 = 1.0 / (mid ** 0.5)
    w1 = jax.random.uniform(kw1, (mid, n_hid_total), jnp.float32, -lim1, lim1)
    b1 = jax.random.uniform(kb1, (mid,), jnp.float32, -lim1, lim1)
    w2 = jax.random.uniform(kw2, (n_out, mid), jnp.float32, -lim2, lim2)
    b2 = jax.random.uniform(kb2, (n_out,), jnp.float32, -lim2, lim2)

    # One-time parameter prep (folding + padding), outside the hot path.
    w_pad, b_pad, n_out_eff = prepare_params(w1, b1, w2, b2)
    w_pad, b_pad = jax.block_until_ready((w_pad, b_pad))

    ref = reference(x, w1, b1, w2, b2)

    # 1) Default path: narrow (B, n_out) output — no post-kernel slice pass.
    out = jax.block_until_ready(hierachy_classify(x, w_pad, b_pad, n_out_eff))
    assert out.shape == (B, n_out)
    assert jnp.allclose(out, ref, atol=1e-5, rtol=1e-5), "mismatch vs reference"

    # 2) Lane-dense padded-output variant (consumer fuses the column slice).
    out_pad = jax.block_until_ready(
        hierachy_classify(x, w_pad, b_pad, n_out_eff, lane_dense_out=True))
    assert out_pad.shape == (B, _LANE)
    assert jnp.allclose(out_pad[:, :n_out], ref, atol=1e-5, rtol=1e-5), \
        "lane-dense variant mismatch vs reference"

    # 3) Larger batch exercising the multi-block "parallel" grid path.
    B2 = 64
    x2 = jax.random.normal(kx2, (B2, n_hid_total), dtype=jnp.float32)
    out2 = jax.block_until_ready(hierachy_classify(x2, w_pad, b_pad, n_out_eff))
    ref2 = reference(x2, w1, b1, w2, b2)
    assert out2.shape == (B2, n_out)
    assert jnp.allclose(out2, ref2, atol=1e-5, rtol=1e-5), "gridded path mismatch"

    print("KERNEL_OK")
</pallas_src>

<mosaic_0001>
module attributes {stable_mosaic.version = 11 : i64} {
  func.func @hierachy_classify_kernel(%arg0: i32, %arg1: memref<8x32xf32, #tpu.memory_space<vmem>>, %arg2: memref<32x128xf32, #tpu.memory_space<vmem>>, %arg3: memref<1x128xf32, #tpu.memory_space<vmem>>, %arg4: memref<8x10xf32, #tpu.memory_space<vmem>>) attributes {dimension_semantics = [#tpu.dimension_semantics<parallel>], iteration_bounds = array<i64: 1>, scalar_prefetch = 0 : i64, scratch_operands = 0 : i64, tpu.core_type = #tpu.core_type<tc>, window_params = [{transform_indices = @transform_0, window_bounds = array<i64: 8, 32>}, {pipeline_mode = #tpu.pipeline_mode<synchronous>, transform_indices = @transform_1, window_bounds = array<i64: 32, 128>}, {pipeline_mode = #tpu.pipeline_mode<synchronous>, transform_indices = @transform_2, window_bounds = array<i64: 1, 128>}, {transform_indices = @transform_3, window_bounds = array<i64: 8, 10>}]} {
    %c0 = arith.constant 0 : index
    %c0_0 = arith.constant 0 : index
    %0 = vector.load %arg1[%c0, %c0_0] : memref<8x32xf32, #tpu.memory_space<vmem>>, vector<8x32xf32>
    %c0_1 = arith.constant 0 : index
    %c0_2 = arith.constant 0 : index
    %1 = vector.load %arg2[%c0_1, %c0_2] : memref<32x128xf32, #tpu.memory_space<vmem>>, vector<32x128xf32>
    %cst = arith.constant dense<0.000000e+00> : vector<8x128xf32>
    %2 = tpu.matmul %0, %1, %cst {dimension_numbers = #tpu.dot_dimension_numbers<[1], [0], [0], [1], [0, 0, 1, 1], [], []>} : vector<8x32xf32>, vector<32x128xf32>, vector<8x128xf32> -> vector<8x128xf32>
    %c0_3 = arith.constant 0 : index
    %c0_4 = arith.constant 0 : index
    %3 = vector.load %arg3[%c0_3, %c0_4] : memref<1x128xf32, #tpu.memory_space<vmem>>, vector<1x128xf32>
    %4 = vector.broadcast %3 : vector<1x128xf32> to vector<8x128xf32>
    %5 = arith.addf %2, %4 : vector<8x128xf32>
    %cst_5 = arith.constant dense<0xFF800000> : vector<8xf32>
    %6 = vector.multi_reduction <maximumf>, %5, %cst_5 [1] : vector<8x128xf32> to vector<8xf32>
    %7 = vector.shape_cast %6 : vector<8xf32> to vector<8x1xf32>
    %8 = vector.broadcast %7 : vector<8x1xf32> to vector<8x128xf32>
    %9 = arith.subf %5, %8 : vector<8x128xf32>
    %10 = math.exp %9 : vector<8x128xf32>
    %cst_6 = arith.constant dense<0.000000e+00> : vector<8xf32>
    %11 = vector.multi_reduction <add>, %10, %cst_6 [1] : vector<8x128xf32> to vector<8xf32>
    %12 = vector.shape_cast %11 : vector<8xf32> to vector<8x1xf32>
    %13 = math.log %12 : vector<8x1xf32>
    %14 = vector.broadcast %13 : vector<8x1xf32> to vector<8x128xf32>
    %15 = arith.subf %9, %14 : vector<8x128xf32>
    %16 = vector.extract_strided_slice %15 {offsets = [0, 0], sizes = [8, 10], strides = [1, 1]} : vector<8x128xf32> to vector<8x10xf32>
    %c0_7 = arith.constant 0 : index
    %c0_8 = arith.constant 0 : index
    %17 = vector.load %arg4[%c0_7, %c0_8] : memref<8x10xf32, #tpu.memory_space<vmem>>, vector<8x10xf32>
    tpu.vector_store %arg4[%c0_7, %c0_8], %16 {strides = array<i32>} : memref<8x10xf32, #tpu.memory_space<vmem>>, vector<8x10xf32>,
    return
  }
  func.func @transform_0(%arg0: i32) -> (i32, i32) {
    %c0_i32 = arith.constant 0 : i32
    %c0_i32_0 = arith.constant 0 : i32
    return %arg0, %c0_i32 : i32, i32
  }
  func.func @transform_1(%arg0: i32) -> (i32, i32) {
    %c0_i32 = arith.constant 0 : i32
    %c0_i32_0 = arith.constant 0 : i32
    %c0_i32_1 = arith.constant 0 : i32
    return %c0_i32, %c0_i32_0 : i32, i32
  }
  func.func @transform_2(%arg0: i32) -> (i32, i32) {
    %c0_i32 = arith.constant 0 : i32
    %c0_i32_0 = arith.constant 0 : i32
    %c0_i32_1 = arith.constant 0 : i32
    return %c0_i32, %c0_i32_0 : i32, i32
  }
  func.func @transform_3(%arg0: i32) -> (i32, i32) {
    %c0_i32 = arith.constant 0 : i32
    %c0_i32_0 = arith.constant 0 : i32
    return %arg0, %c0_i32 : i32, i32
  }
}

</mosaic_0001>

<bundles_post_ra>
// kernel: tpu_custom_call.1
= control target key start
LH: loop header
LB: loop body
LE: loop exit
PB: predicated region body
PF: predicated region fallthrough
CT: control target
= control target key end

     0   :  { %8 = vsyncpa [#allocation3], 0  ;;  %s337_s0 = inlined_call_operand.hbm [shape: f32[8,32], index: 0, kind: input, shape index: {}]   ;;  %s338_s1 = inlined_call_operand.hbm [shape: f32[32,128], index: 1, kind: input, shape index: {}]   ;;  %s339_s2 = inlined_call_operand.vmem [shape: f32[1,128], index: 2, kind: input, shape index: {}]   ;;  %s340_s3 = inlined_call_operand.hbm [shape: f32[8,10], index: 3, kind: output, shape index: {}]  }
   0x1   :  { %9 = vsyncpa [#allocation6], 0 }
   0x2   :  { %10 = vsyncpa [#allocation4], 0  ;;  %s263_s12 = smov [#allocation2]   ;;  %s264_s14 = smov [#allocation5]  }
   0x3   :  { %s17_s13 = sshll.u32 %s263_s12, 4  ;;  %s26_s15 = sshll.u32 %s264_s14, 4  ;;  %s18_s13 = int_to_ptr.vmem [resolvable:$true] %s17_s13  ;;  %s291_s15 = int_to_ptr.vmem [resolvable:$true] %s26_s15 }
   0x4   :  { %s191_s18 = scalar_lea.hbm %s337_s0, 128 }
   0x5   :  { %p192_p0 = scmp.ne.s32.totalorder %s337_s0, %s191_s18  ;;  %p195_p1 = scmp.lt.u32.totalorder %s191_s18, %s337_s0 }
   0x7   :  { %p197_p2 = pnand %p195_p1, %p192_p0 }
   0x9   :  { %200 = shalt.err (!%p197_p2)
}
   0xa   :  { %s201_s23 = scalar_lea.vmem %s18_s13, 128  ;;  %p206_p4 = scmp.lt.s32.totalorder %s18_s13, %s18_s13 }
   0xb   :  { %p202_p3 = scmp.ne.s32.totalorder %s18_s13, %s201_s23  ;;  %p207_p5 = scmp.lt.s32.totalorder %s201_s23, %s201_s23 }
   0xd   :  { %p208_p6 = por %p207_p5, %p206_p4 }
   0xf   :  { %p209_p7 = pnand %p208_p6, %p202_p3 }
  0x11   :  { %212 = shalt.err (!%p209_p7)
}
  0x12   :  { %20 = dma.hbm_to_vmem [thread:$0]  %s337_s0, 128, %s18_s13, [#allocation3]  }
  0x13   :  { %s213_s28 = scalar_lea.hbm %s338_s1, 512 }
  0x14   :  { %p214_p8 = scmp.ne.s32.totalorder %s338_s1, %s213_s28  ;;  %p217_p9 = scmp.lt.u32.totalorder %s213_s28, %s338_s1 }
  0x16   :  { %p219_p10 = pnand %p217_p9, %p214_p8 }
  0x18   :  { %222 = shalt.err (!%p219_p10)
}
  0x19   :  { %s223_s6 = scalar_lea.vmem %s291_s15, 512  ;;  %p228_p12 = scmp.lt.s32.totalorder %s291_s15, %s291_s15 }
  0x1a   :  { %p224_p11 = scmp.ne.s32.totalorder %s291_s15, %s223_s6  ;;  %p229_p13 = scmp.lt.s32.totalorder %s223_s6, %s223_s6 }
  0x1c   :  { %p230_p0 = por %p229_p13, %p228_p12 }
  0x1e   :  { %p231_p1 = pnand %p230_p0, %p224_p11 }
  0x20   :  { %234 = shalt.err (!%p231_p1)
}
  0x21   :  { %s265_s0 = smov 128   ;;  %s266_s7 = smov 8  }
  0x22   :  { %32 = dma.hbm_to_vmem [thread:$0]  %s338_s1, 512, %s291_s15, [#allocation6], %s265_s0, %s265_s0, %s266_s7  }
  0x23   :  { %257 = dma.done.wait [#allocation3], 128  }
  0x24   :  { %258 = vsyncadd [#allocation3], 4294967168 }
  0x25   :  { %259 = dma.done.wait [#allocation6], 512  }
  0x26   :  { %260 = vsyncadd [#allocation6], 4294966784  ;;  %v267_v0 = vmov 0.0|0.0   ;;  %vm268_vm0 = vmmov 0   ;;  %v269_v1 = vmov 0.0   ;;  %v42_v2 = vld [vmem:[#allocation5] sm:$0xff] }
  0x27   :  { %173 = vmatprep.subr.bf16.mxu0 %v267_v0  ;;  %170 = vmatprep.mubr.msk.f32.mxu0 %vm268_vm0, %v269_v1  ;;  %v43_v3 = vld [vmem:[#allocation5 + $0x8] sm:$0xff]  ;;  %v44_v4 = vld [vmem:[#allocation5 + $0x10] sm:$0xff]  ;;  %v45_v6 = vld [vmem:[#allocation5 + $0x18] sm:$0xff]  ;;  %vm53_vm1 = vcmask 261120   ;;  %s270_s11 = smov [#allocation7]   ;;  %vm137_vm2 = vcmask 80896  }
  0x28   :  { %v174_v5 = vpack.c.bf16 %v43_v3, %v42_v2  ;;  %v177_v7 = vpack.c.bf16 %v45_v6, %v44_v4  ;;  %v41_v8 = vld [vmem:[#allocation2] sm:$0xff]  ;;  %s145_s12 = sshll.u32 %s270_s11, 4  ;;  %s146_s12 = int_to_ptr.vmem [resolvable:$true] %s145_s12 }
  0x29   :  { %v155_v9 = vld [vmem:[%s339_s2] ss:$0 sm:$0xff]  ;;  %s235_s2 = scalar_lea.vmem %s146_s12, 128  ;;  %p240_p3 = scmp.lt.s32.totalorder %s146_s12, %s146_s12 }
  0x2a   :  { %175 = vmatpush3.bf16.msra.mxu0 %v174_v5  ;;  %p236_p2 = scmp.ne.s32.totalorder %s146_s12, %s235_s2  ;;  %p241_p4 = scmp.lt.s32.totalorder %s235_s2, %s235_s2 }
  0x2b   :  { %176 = vmatprep.subr.bf16.mxu0 %v267_v0 }
  0x2c   :  { %p242_p5 = por %p241_p4, %p240_p3 }
  0x2e   :  { %178 = vmatpush3.bf16.msra.mxu0 %v177_v7  ;;  %p243_p6 = pnand %p242_p5, %p236_p2 }
  0x31   :  { %171 = vmatmul.mubr.msk.f32.vlgmr.msra.gmra.mrb[0].mxu0 %vm53_vm1, %v41_v8 }
 0x104   :  { %v123_v10 = vpop.f32.mrb[0].mxu0 }
 0x105   :  { %v124_v11 = vadd.f32 %v155_v9, %v123_v10  ;;  %v172_v12 = vpop.f32.mrb[1].mxu0 }
 0x107   :  { %127 = vmax.xlane.f32.xlu0 %v124_v11 }
 0x194   :  { %v128_v13 = vpop.xlane.xlu0 %127 }
 0x195   :  { %v129_v14 = vsub.f32 %v124_v11, %v128_v13 }
 0x197   :  { %v130_v15 = vmul.f32 1.442695, %v129_v14 }
 0x199   :  { %187 = vpow2.f32 %v130_v15 }
 0x1a3   :  { %v188_v16 = vpop.eup %187 }
 0x1a4   :  { %132 = vadd.xlane.f32.xlu0 %v188_v16 }
 0x231   :  { %v133_v17 = vpop.xlane.xlu0 %132 }
 0x232   :  { %189 = vlog2.f32 %v133_v17 }
 0x23c   :  { %v190_v18 = vpop.eup %189 }
 0x23d   :  { %v135_v19 = vmul.f32 0.6931472, %v190_v18 }
 0x23f   :  { %v136_v20 = vsub.f32 %v129_v14, %v135_v19 }
 0x241   :  { %138 = vst.msk [vmem:[#allocation7] sm:$0xff] %vm137_vm2, %v136_v20 }
 0x242   :  { %246 = shalt.err (!%p243_p6)
}
 0x243   :  { %s247_s15 = scalar_lea.hbm %s340_s3, 128 }
 0x244   :  { %p248_p7 = scmp.ne.s32.totalorder %s340_s3, %s247_s15  ;;  %p251_p8 = scmp.lt.u32.totalorder %s247_s15, %s340_s3 }
 0x246   :  { %p253_p9 = pnand %p251_p8, %p248_p7 }
 0x248   :  { %256 = shalt.err (!%p253_p9)
}
 0x249   :  { %148 = dma.vmem_to_hbm [thread:$0]  %s146_s12, 128, %s340_s3, [#allocation4]  }
 0x24a   :  { %261 = dma.done.wait [#allocation4], 128  }
 0x24b   :  { %262 = vsyncadd [#allocation4], 4294967168 }
 0x24c   :  { %152 = vsyncpa [#allocation3], 1 }
 0x24d   :  { %153 = vsyncpa [#allocation6], 1 }
 0x24e   :  { %154 = vsyncpa [#allocation4], 1 }

</bundles_post_ra>
